<compile_context>
chip_gen: v7x
topology: tpu7x:2x2x1
jax: 0.10.0
libtpu: 0.0.40
codegen_flags: <defaults>
</compile_context>

<pallas_src>
import jax
import jax.numpy as jnp
from jax.experimental import pallas as pl
from jax.experimental.pallas import tpu as pltpu

EPS = 1e-5


def _round_up(v, m):
    return ((v + m - 1) // m) * m


# ---------------------------------------------------------------------------
# One-time (hoisted) parameter folding + packing -> single weight slab.
# ---------------------------------------------------------------------------
def pack_params(params, input_dim, hidden_layers, eps=EPS):
    """Fold BN (eval form) into the next Linear and pack everything into one slab.

    `params` is the PyTorch-style flat list (weights already stored [in, out]):
      per hidden layer: W [in,u], b [1,u], gamma, beta, mean, var (all [1,u])
      final layer:      W [in,1], b [1,1]

    BN fold (eval):   bn(h) = s*h + t,  s = gamma*rsqrt(var+eps), t = beta - mean*s
                      bn(h) @ W + b == h @ (s[:,None]*W) + (b + t @ W)

    Bias fold: x is augmented with a constant-1 column; each layer block stores
    its bias in the row driven by that constant and writes a fresh constant-1
    "carrier" column (relu(1) = 1) feeding the next layer, so the kernel is a
    pure chain of matmuls.

    Returns (w_slab [R, width] f32, row_ranges, in_pad0, width).
    """
    num_hidden = len(hidden_layers)
    width = _round_up(max(hidden_layers) + 1, 128)   # lane width of every block
    in_pad0 = _round_up(input_dim + 1, 8)            # +1 = constant-1 column

    # ---- fold each BatchNorm into the following Linear (f32) ----
    Ws, Bs = [], []
    idx = 0
    s_prev = t_prev = None
    for _ in range(num_hidden):
        w, b, gamma, beta, mean, var = [
            p.astype(jnp.float32) for p in params[idx:idx + 6]]
        idx += 6
        if s_prev is not None:
            b = b + t_prev @ w
            w = s_prev.reshape(-1, 1) * w
        s_prev = gamma * jax.lax.rsqrt(var + eps)    # [1, units]
        t_prev = beta - mean * s_prev                # [1, units]
        Ws.append(w)
        Bs.append(b)
    w_out, b_out = [p.astype(jnp.float32) for p in params[idx:idx + 2]]
    b_out = b_out + t_prev @ w_out                   # last BN -> output Linear
    w_out = s_prev.reshape(-1, 1) * w_out
    Ws.append(w_out)
    Bs.append(b_out)

    # ---- pack into one [R, width] slab ----
    n_layers = num_hidden + 1
    blocks, row_ranges = [], []
    row = 0
    for li in range(n_layers):
        w, b = Ws[li], Bs[li]
        in_dim, out_dim = w.shape
        assert out_dim < width, "hidden width must leave room for carrier column"
        in_rows = in_pad0 if li == 0 else width
        assert in_dim + 1 <= in_rows
        blk = jnp.zeros((in_rows, width), jnp.float32)
        blk = blk.at[:in_dim, :out_dim].set(w)
        blk = blk.at[in_dim, :out_dim].set(b.reshape(-1))   # bias row (constant-1 driven)
        if li < n_layers - 1:
            blk = blk.at[in_dim, out_dim].set(1.0)          # carrier for next layer's bias
        blocks.append(blk)
        row_ranges.append((row, row + in_rows))
        row += in_rows

    w_slab = jnp.concatenate(blocks, axis=0)
    return w_slab, tuple(row_ranges), in_pad0, width


# ---------------------------------------------------------------------------
# Kernel + jitted forward
# ---------------------------------------------------------------------------
def make_kernel(row_ranges, num_hidden):
    n_layers = num_hidden + 1

    def kernel(x_ref, w_ref, o_ref):
        # x_ref : [N, in_pad0]  augmented input (constant-1 column included)
        # w_ref : [R, width]    packed slab (BN + biases already folded in)
        # o_ref : [N, 1]
        h = x_ref[...]
        for li, (r0, r1) in enumerate(row_ranges):
            # Linear on the MXU; static ref slices are zero-cost, sublane-aligned views.
            h = jnp.dot(h, w_ref[r0:r1, :], preferred_element_type=jnp.float32)
            if li < n_layers - 1:
                h = jnp.maximum(h, 0.0)          # ReLU; Dropout = identity (eval)
        # Only lane 0 of the last block is populated -> emit the true (N, 1) output.
        o_ref[...] = h[:, :1]

    return kernel


def build_boston_forward(input_dim, hidden_layers, in_pad0, width, row_ranges):
    kernel = make_kernel(row_ranges, len(hidden_layers))
    total_rows = row_ranges[-1][1]

    def forward(x, w_slab):
        n = x.shape[0]
        # Augment x: [x | 1 | 0-pad] -> [N, in_pad0]; one tiny fused op under jit.
        pieces = [x.astype(jnp.float32), jnp.ones((n, 1), jnp.float32)]
        if in_pad0 > input_dim + 1:
            pieces.append(jnp.zeros((n, in_pad0 - input_dim - 1), jnp.float32))
        x_aug = jnp.concatenate(pieces, axis=1)

        flops = 2 * n * sum((r1 - r0) * width for r0, r1 in row_ranges)
        bytes_accessed = 4 * (n * in_pad0 + total_rows * width + n)

        return pl.pallas_call(
            kernel,
            out_shape=jax.ShapeDtypeStruct((n, 1), jnp.float32),
            # Tiny working set (<200 KiB): whole arrays as single VMEM blocks in
            # one gridless invocation (a grid would be pure per-step overhead).
            in_specs=[pl.BlockSpec(memory_space=pltpu.MemorySpace.VMEM)] * 2,
            out_specs=pl.BlockSpec(memory_space=pltpu.MemorySpace.VMEM),
            cost_estimate=pl.CostEstimate(flops=flops, transcendentals=0,
                                          bytes_accessed=bytes_accessed),
        )(x_aug, w_slab)

    return jax.jit(forward)


# ---------------------------------------------------------------------------
# Param init (PyTorch-like) + pure-JAX reference on the ORIGINAL params.
# ---------------------------------------------------------------------------
def init_params(key, input_dim, hidden_layers):
    """Weights stored [in, out] (transposed vs. PyTorch's [out, in]); BN running
    stats randomized so the folding is actually exercised."""
    params = []
    in_dim = input_dim
    for units in hidden_layers:
        key, kw, kb, kg, kbe, km, kv = jax.random.split(key, 7)
        bound = 1.0 / jnp.sqrt(jnp.float32(in_dim))
        w = jax.random.uniform(kw, (in_dim, units), jnp.float32, -bound, bound)
        b = jax.random.uniform(kb, (1, units), jnp.float32, -bound, bound)
        gamma = 1.0 + 0.1 * jax.random.normal(kg, (1, units), jnp.float32)
        beta = 0.1 * jax.random.normal(kbe, (1, units), jnp.float32)
        mean = 0.1 * jax.random.normal(km, (1, units), jnp.float32)
        var = jax.random.uniform(kv, (1, units), jnp.float32, 0.5, 1.5)
        params += [w, b, gamma, beta, mean, var]
        in_dim = units
    key, kw, kb = jax.random.split(key, 3)
    bound = 1.0 / jnp.sqrt(jnp.float32(in_dim))
    w = jax.random.uniform(kw, (in_dim, 1), jnp.float32, -bound, bound)
    b = jax.random.uniform(kb, (1, 1), jnp.float32, -bound, bound)
    params += [w, b]
    return params


def reference_forward(x, params, num_hidden, eps=EPS):
    """Pure-JAX reference on the ORIGINAL (unfolded) params, eval semantics."""
    h = x
    idx = 0
    for _ in range(num_hidden):
        w, b, gamma, beta, mean, var = params[idx:idx + 6]
        idx += 6
        h = h @ w + b
        h = jnp.maximum(h, 0.0)                 # ReLU; Dropout = identity (eval)
        h = gamma * (h - mean) / jnp.sqrt(var + eps) + beta
    w, b = params[idx:idx + 2]
    return h @ w + b


if __name__ == "__main__":
    # Boston Housing: 13 input features.  Small synthetic shapes.
    batch = 8
    input_dim = 13
    hidden_layers = [32, 16]
    dropout_rate = 0.2  # identity in eval mode; unused in forward

    key = jax.random.PRNGKey(0)
    key, kx = jax.random.split(key)
    x = jax.random.normal(kx, (batch, input_dim), jnp.float32)
    params = init_params(key, input_dim, hidden_layers)

    # One-time (hoisted) fold + pack; the slab is a device-resident constant.
    w_slab, row_ranges, in_pad0, width = pack_params(params, input_dim, hidden_layers)
    w_slab = jax.device_put(jax.block_until_ready(w_slab))

    forward = build_boston_forward(input_dim, hidden_layers, in_pad0, width, row_ranges)

    out = forward(x, w_slab)
    out = jax.block_until_ready(out)

    ref = reference_forward(x, params, num_hidden=len(hidden_layers))
    assert out.shape == (batch, 1), out.shape
    assert jnp.allclose(out, ref, atol=1e-4, rtol=1e-4), (out, ref)

    print("KERNEL_OK")
</pallas_src>

<mosaic_0001>
module attributes {stable_mosaic.version = 11 : i64} {
  func.func @kernel(%arg0: memref<8x16xf32, #tpu.memory_space<vmem>>, %arg1: memref<272x128xf32, #tpu.memory_space<vmem>>, %arg2: memref<8x1xf32, #tpu.memory_space<vmem>>) attributes {dimension_semantics = [], scalar_prefetch = 0 : i64, scratch_operands = 0 : i64, tpu.core_type = #tpu.core_type<tc>} {
    %c0 = arith.constant 0 : index
    %c0_0 = arith.constant 0 : index
    %0 = vector.load %arg0[%c0, %c0_0] : memref<8x16xf32, #tpu.memory_space<vmem>>, vector<8x16xf32>
    %c0_1 = arith.constant 0 : index
    %c0_2 = arith.constant 0 : index
    %1 = vector.load %arg1[%c0_1, %c0_2] : memref<272x128xf32, #tpu.memory_space<vmem>>, vector<16x128xf32>
    %cst = arith.constant dense<0.000000e+00> : vector<8x128xf32>
    %2 = tpu.matmul %0, %1, %cst {dimension_numbers = #tpu.dot_dimension_numbers<[1], [0], [0], [1], [0, 0, 1, 1], [], []>} : vector<8x16xf32>, vector<16x128xf32>, vector<8x128xf32> -> vector<8x128xf32>
    %cst_3 = arith.constant 0.000000e+00 : f32
    %3 = vector.broadcast %cst_3 : f32 to vector<8x128xf32>
    %4 = arith.maximumf %2, %3 : vector<8x128xf32>
    %c16 = arith.constant 16 : index
    %c0_4 = arith.constant 0 : index
    %5 = vector.load %arg1[%c16, %c0_4] : memref<272x128xf32, #tpu.memory_space<vmem>>, vector<128x128xf32>
    %cst_5 = arith.constant dense<0.000000e+00> : vector<8x128xf32>
    %6 = tpu.matmul %4, %5, %cst_5 {dimension_numbers = #tpu.dot_dimension_numbers<[1], [0], [0], [1], [0, 0, 1, 1], [], []>} : vector<8x128xf32>, vector<128x128xf32>, vector<8x128xf32> -> vector<8x128xf32>
    %cst_6 = arith.constant 0.000000e+00 : f32
    %7 = vector.broadcast %cst_6 : f32 to vector<8x128xf32>
    %8 = arith.maximumf %6, %7 : vector<8x128xf32>
    %c144 = arith.constant 144 : index
    %c0_7 = arith.constant 0 : index
    %9 = vector.load %arg1[%c144, %c0_7] : memref<272x128xf32, #tpu.memory_space<vmem>>, vector<128x128xf32>
    %cst_8 = arith.constant dense<0.000000e+00> : vector<8x128xf32>
    %10 = tpu.matmul %8, %9, %cst_8 {dimension_numbers = #tpu.dot_dimension_numbers<[1], [0], [0], [1], [0, 0, 1, 1], [], []>} : vector<8x128xf32>, vector<128x128xf32>, vector<8x128xf32> -> vector<8x128xf32>
    %11 = vector.extract_strided_slice %10 {offsets = [0, 0], sizes = [8, 1], strides = [1, 1]} : vector<8x128xf32> to vector<8x1xf32>
    %c0_9 = arith.constant 0 : index
    %c0_10 = arith.constant 0 : index
    %12 = vector.load %arg2[%c0_9, %c0_10] : memref<8x1xf32, #tpu.memory_space<vmem>>, vector<8x1xf32>
    tpu.vector_store %arg2[%c0_9, %c0_10], %11 {strides = array<i32>} : memref<8x1xf32, #tpu.memory_space<vmem>>, vector<8x1xf32>,
    return
  }
}

</mosaic_0001>

<bundles_post_ra>
// kernel: forward.1
= control target key start
LH: loop header
LB: loop body
LE: loop exit
PB: predicated region body
PF: predicated region fallthrough
CT: control target
= control target key end

     0   :  { %7 = vsyncpa [#allocation3], 0  ;;  %s479_s9 = smov [#allocation2]   ;;  %s538_s0 = inlined_call_operand.vmem [shape: f32[8,16], index: 0, kind: input, shape index: {}]   ;;  %s539_s1 = inlined_call_operand.hbm [shape: f32[272,128], index: 1, kind: input, shape index: {}]   ;;  %s540_s2 = inlined_call_operand.vmem [shape: f32[8,1], index: 2, kind: output, shape index: {}]  }
   0x1   :  { %s15_s10 = sshll.u32 %s479_s9, 4  ;;  %s455_s13 = scalar_lea.hbm %s539_s1, 4352  ;;  %s16_s10 = int_to_ptr.vmem [resolvable:$true] %s15_s10 }
   0x2   :  { %p456_p0 = scmp.ne.s32.totalorder %s539_s1, %s455_s13  ;;  %p459_p1 = scmp.lt.u32.totalorder %s455_s13, %s539_s1 }
   0x4   :  { %p461_p2 = pnand %p459_p1, %p456_p0 }
   0x6   :  { %464 = shalt.err (!%p461_p2)
}
   0x7   :  { %s465_s18 = scalar_lea.vmem %s16_s10, 4352  ;;  %p470_p4 = scmp.lt.s32.totalorder %s16_s10, %s16_s10 }
   0x8   :  { %p466_p3 = scmp.ne.s32.totalorder %s16_s10, %s465_s18  ;;  %p471_p5 = scmp.lt.s32.totalorder %s465_s18, %s465_s18 }
   0xa   :  { %p472_p6 = por %p471_p5, %p470_p4 }
   0xc   :  { %p473_p7 = pnand %p472_p6, %p466_p3 }
   0xe   :  { %476 = shalt.err (!%p473_p7)
}
   0xf   :  { %s480_s19 = smov 128   ;;  %s481_s20 = smov 8  }
  0x10   :  { %21 = dma.hbm_to_vmem [thread:$0]  %s539_s1, 4352, %s16_s10, [#allocation3], %s480_s19, %s480_s19, %s481_s20  }
  0x11   :  { %477 = dma.done.wait [#allocation3], 4352  }
  0x12   :  { %478 = vsyncadd [#allocation3], 4294962944  ;;  %v482_v0 = vmov 0.0|0.0   ;;  %vm483_vm0 = vmmov 0   ;;  %v484_v1 = vmov 0.0   ;;  %v26_v2 = vld [vmem:[#allocation2] sm:$0xff] }
  0x13   :  { %398 = vmatprep.subr.bf16.mxu0 %v482_v0  ;;  %325 = vmatprep.mubr.msk.f32.mxu0 %vm483_vm0, %v484_v1  ;;  %v27_v3 = vld [vmem:[#allocation2 + $0x8] sm:$0xff]  ;;  %v103_v5 = vld [vmem:[#allocation2 + $0x10] sm:$0xff]  ;;  %v104_v6 = vld [vmem:[#allocation2 + $0x18] sm:$0xff]  ;;  %vm28_vm1 = vcmask 130048   ;;  %vm276_vm2 = vcmask 7168  }
  0x14   :  { %401 = vmatprep.subr.bf16.mxu1 %v482_v0  ;;  %360 = vmatprep.mubr.msk.f32.mxu1 %vm483_vm0, %v484_v1  ;;  %v399_v4 = vpack.c.bf16 %v27_v3, %v26_v2  ;;  %v105_v7 = vld [vmem:[#allocation2 + $0x20] sm:$0xff]  ;;  %v402_v8 = vpack.c.bf16 %v104_v6, %v103_v5  ;;  %v106_v9 = vld [vmem:[#allocation2 + $0x28] sm:$0xff]  ;;  %v107_v12 = vld [vmem:[#allocation2 + $0x30] sm:$0xff] }
  0x15   :  { %v25_v10 = vld [vmem:[%s538_s0] sm:$0xff]  ;;  %v405_v11 = vpack.c.bf16 %v106_v9, %v105_v7  ;;  %v108_v13 = vld [vmem:[#allocation2 + $0x38] sm:$0xff]  ;;  %v110_v16 = vld [vmem:[#allocation2 + $0x48] sm:$0xff] }
  0x16   :  { %400 = vmatpush3.bf16.msra.mxu0 %v399_v4  ;;  %403 = vmatpush3.bf16.msra.mxu1 %v402_v8  ;;  %v408_v14 = vpack.c.bf16 %v108_v13, %v107_v12  ;;  %v109_v15 = vld [vmem:[#allocation2 + $0x40] sm:$0xff]  ;;  %v111_v18 = vld [vmem:[#allocation2 + $0x50] sm:$0xff]  ;;  %v112_v19 = vld [vmem:[#allocation2 + $0x58] sm:$0xff] }
  0x17   :  { %425 = vmatprep.subr.bf16.mxu0 %v482_v0  ;;  %404 = vmatprep.subr.bf16.mxu1 %v482_v0  ;;  %v411_v17 = vpack.c.bf16 %v110_v16, %v109_v15  ;;  %v414_v20 = vpack.c.bf16 %v112_v19, %v111_v18  ;;  %v113_v21 = vld [vmem:[#allocation2 + $0x60] sm:$0xff]  ;;  %v114_v22 = vld [vmem:[#allocation2 + $0x68] sm:$0xff]  ;;  %v115_v24 = vld [vmem:[#allocation2 + $0x70] sm:$0xff] }
  0x18   :  { %v417_v23 = vpack.c.bf16 %v114_v22, %v113_v21  ;;  %v116_v25 = vld [vmem:[#allocation2 + $0x78] sm:$0xff]  ;;  %v117_v27 = vld [vmem:[#allocation2 + $0x80] sm:$0xff]  ;;  %v118_v28 = vld [vmem:[#allocation2 + $0x88] sm:$0xff] }
  0x19   :  { %326 = vmatmul.mubr.msk.f32.vlgmr.msra.gmra.mrb[0].mxu0 %vm28_vm1, %v25_v10  ;;  %v420_v26 = vpack.c.bf16 %v116_v25, %v115_v24  ;;  %v423_v29 = vpack.c.bf16 %v118_v28, %v117_v27  ;;  %v190_v30 = vld [vmem:[#allocation2 + $0x90] sm:$0xff]  ;;  %v191_v31 = vld [vmem:[#allocation2 + $0x98] sm:$0xff]  ;;  %v192_v32 = vld [vmem:[#allocation2 + $0xa0] sm:$0xff] }
  0x1a   :  { %395 = vmatprep.mubr.msk.f32.mxu0 %vm483_vm0, %v484_v1  ;;  %406 = vmatpush3.bf16.msra.mxu1 %v405_v11  ;;  %v426_v33 = vpack.c.bf16 %v191_v31, %v190_v30  ;;  %v193_v34 = vld [vmem:[#allocation2 + $0xa8] sm:$0xff]  ;;  %v194_v36 = vld [vmem:[#allocation2 + $0xb0] sm:$0xff]  ;;  %v195_v37 = vld [vmem:[#allocation2 + $0xb8] sm:$0xff] }
  0x1b   :  { %407 = vmatprep.subr.bf16.mxu1 %v482_v0  ;;  %v429_v35 = vpack.c.bf16 %v193_v34, %v192_v32  ;;  %v432_v38 = vpack.c.bf16 %v195_v37, %v194_v36  ;;  %v196_v39 = vld [vmem:[#allocation2 + $0xc0] sm:$0xff]  ;;  %v197_v40 = vld [vmem:[#allocation2 + $0xc8] sm:$0xff]  ;;  %v198_v42 = vld [vmem:[#allocation2 + $0xd0] sm:$0xff] }
  0x1c   :  { %427 = vmatpush3.bf16.msra.mxu0 %v426_v33  ;;  %v435_v41 = vpack.c.bf16 %v197_v40, %v196_v39  ;;  %v199_v43 = vld [vmem:[#allocation2 + $0xd8] sm:$0xff]  ;;  %v200_v45 = vld [vmem:[#allocation2 + $0xe0] sm:$0xff]  ;;  %v201_v46 = vld [vmem:[#allocation2 + $0xe8] sm:$0xff] }
  0x1d   :  { %428 = vmatprep.subr.bf16.mxu0 %v482_v0  ;;  %v438_v44 = vpack.c.bf16 %v199_v43, %v198_v42  ;;  %v441_v47 = vpack.c.bf16 %v201_v46, %v200_v45  ;;  %v202_v48 = vld [vmem:[#allocation2 + $0xf0] sm:$0xff]  ;;  %v203_v49 = vld [vmem:[#allocation2 + $0xf8] sm:$0xff]  ;;  %v204_v54 = vld [vmem:[#allocation2 + $0x100] sm:$0xff] }
  0x1e   :  { %409 = vmatpush3.bf16.msra.mxu1 %v408_v14  ;;  %v444_v50 = vpack.c.bf16 %v203_v49, %v202_v48  ;;  %v205_v55 = vld [vmem:[#allocation2 + $0x108] sm:$0xff] }
  0x1f   :  { %410 = vmatprep.subr.bf16.mxu1 %v482_v0  ;;  %v447_v56 = vpack.c.bf16 %v205_v55, %v204_v54 }
  0x20   :  { %430 = vmatpush3.bf16.msra.mxu0 %v429_v35 }
  0x21   :  { %431 = vmatprep.subr.bf16.mxu0 %v482_v0 }
  0x22   :  { %412 = vmatpush3.bf16.msra.mxu1 %v411_v17 }
  0x23   :  { %413 = vmatprep.subr.bf16.mxu1 %v482_v0 }
  0x24   :  { %433 = vmatpush3.bf16.msra.mxu0 %v432_v38 }
  0x25   :  { %434 = vmatprep.subr.bf16.mxu0 %v482_v0 }
  0x26   :  { %415 = vmatpush3.bf16.msra.mxu1 %v414_v20 }
  0x27   :  { %416 = vmatprep.subr.bf16.mxu1 %v482_v0 }
  0x28   :  { %436 = vmatpush3.bf16.msra.mxu0 %v435_v41 }
  0x29   :  { %437 = vmatprep.subr.bf16.mxu0 %v482_v0 }
  0x2a   :  { %418 = vmatpush3.bf16.msra.mxu1 %v417_v23 }
  0x2b   :  { %419 = vmatprep.subr.bf16.mxu1 %v482_v0 }
  0x2c   :  { %439 = vmatpush3.bf16.msra.mxu0 %v438_v44 }
  0x2d   :  { %440 = vmatprep.subr.bf16.mxu0 %v482_v0 }
  0x2e   :  { %421 = vmatpush3.bf16.msra.mxu1 %v420_v26 }
  0x2f   :  { %422 = vmatprep.subr.bf16.mxu1 %v482_v0 }
  0x30   :  { %442 = vmatpush3.bf16.msra.mxu0 %v441_v47 }
  0x31   :  { %443 = vmatprep.subr.bf16.mxu0 %v482_v0 }
  0x32   :  { %424 = vmatpush3.bf16.msra.mxu1 %v423_v29 }
  0x34   :  { %445 = vmatpush3.bf16.msra.mxu0 %v444_v50 }
  0x35   :  { %446 = vmatprep.subr.bf16.mxu0 %v482_v0 }
  0x38   :  { %448 = vmatpush3.bf16.msra.mxu0 %v447_v56 }
  0xec   :  { %v98_v51 = vpop.f32.mrb[0].mxu0 }
  0xed   :  { %v102_v52 = vmax.f32 %v98_v51, 0.0  ;;  %v327_v53 = vpop.f32.mrb[1].mxu0 }
  0xef   :  { %361 = vmatmul.mubr.f32.vlgmr.msra.gmra.mrb[0].mxu1 %v102_v52 }
 0x1c2   :  { %v185_v57 = vpop.f32.mrb[0].mxu1 }
 0x1c3   :  { %v189_v58 = vmax.f32 %v185_v57, 0.0  ;;  %v362_v59 = vpop.f32.mrb[1].mxu1 }
 0x1c5   :  { %396 = vmatmul.mubr.f32.vlgmr.msra.gmra.mrb[2].mxu0 %v189_v58 }
 0x298   :  { %v272_v60 = vpop.f32.mrb[2].mxu0 }
 0x299   :  { %277 = vst.msk [vmem:[%s540_s2] sm:$0xff] %vm276_vm2, %v272_v60  ;;  %v397_v61 = vpop.f32.mrb[3].mxu0 }
 0x29a   :  { %282 = vsyncpa [#allocation3], 1 }

</bundles_post_ra>
